<compile_context>
chip_gen: v7x
topology: tpu7x:2x2x1
jax: 0.10.0
libtpu: 0.0.40
codegen_flags: <defaults>
</compile_context>

<pallas_src>
import math

import numpy as np
import jax
import jax.numpy as jnp
from jax.experimental import pallas as pl
from jax.experimental.pallas import tpu as pltpu

_SQRT_2_OVER_PI = 0.7978845608028654


def _time_mlp_kernel(x_ref, tbl_ref, w1_ref, b1_ref, w2_ref, b2_ref, o_ref):
    # x_ref:   (TB, 1)              f32   timesteps (one per row)
    # tbl_ref: (2, dim)             f32   row0 = [f, f], row1 = [0, pi/2]
    # w1_ref:  (dim, time_dim)      bf16
    # b1_ref:  (1, time_dim)        f32
    # w2_ref:  (time_dim, time_dim) bf16
    # b2_ref:  (1, time_dim)        f32
    # o_ref:   (TB, time_dim)       f32   (lane-dense, 128-wide)
    x = x_ref[...]                                                # (TB, 1)
    freqs = tbl_ref[0:1, :]                                       # (1, dim)
    phase = tbl_ref[1:2, :]                                       # (1, dim)

    # SinusoidalPosEmb, concat-free:
    #   cat([sin(x*f), cos(x*f)], -1) == sin(x*[f, f] + [0, pi/2])
    emb = jnp.sin(x * freqs + phase)                              # (TB, dim) f32

    # Linear(dim -> time_dim) on the MXU: bf16 operands, f32 accumulation.
    h = jnp.dot(emb.astype(jnp.bfloat16), w1_ref[...],
                preferred_element_type=jnp.float32) + b1_ref[...]

    # GELU (tanh approximation), in f32 -- tanh goes to the EUP slot.
    h = 0.5 * h * (1.0 + jnp.tanh(_SQRT_2_OVER_PI *
                                  (h + 0.044715 * h * h * h)))

    # Linear(time_dim -> time_dim): bf16 operands, f32 accumulation.
    out = jnp.dot(h.astype(jnp.bfloat16), w2_ref[...],
                  preferred_element_type=jnp.float32) + b2_ref[...]

    o_ref[...] = out.astype(o_ref.dtype)


def time_mlp(t, w1, b1, w2, b2, dim, *, block_b=None):
    """Pallas equivalent of Unet.time_mlp(time) for time of shape (B,).

    w1: (dim, time_dim), b1: (time_dim,), w2: (time_dim, time_dim),
    b2: (time_dim,).  Returns (B, time_dim) float32.
    """
    assert dim % 2 == 0 and dim >= 4
    half = dim // 2
    time_dim = w1.shape[1]
    assert w1.shape == (dim, time_dim)
    assert w2.shape == (time_dim, time_dim)
    assert time_dim % 128 == 0, "keep the output lane-dense"

    B = t.shape[0]

    # One grid step for any practical batch of timesteps (<=256 rows/step).
    if block_b is None:
        block_b = min(pl.cdiv(B, 8) * 8, 256)
    assert block_b % 8 == 0
    bp = pl.cdiv(B, block_b) * block_b

    # --- compile-time constant tables (hoisted out of the kernel) ---------
    scale = math.log(10000.0) / (half - 1)
    f = np.exp(np.arange(half, dtype=np.float32) * -scale)
    tbl = np.stack([
        np.concatenate([f, f]),
        np.concatenate([np.zeros(half, np.float32),
                        np.full(half, np.pi / 2.0, np.float32)]),
    ]).astype(np.float32)                                          # (2, dim)

    # --- batch padding to the (single) sublane-aligned block --------------
    x2 = t.astype(jnp.float32).reshape(B, 1)
    if bp != B:
        x2 = jnp.pad(x2, ((0, bp - B), (0, 0)))

    w1_bf = w1.astype(jnp.bfloat16)
    w2_bf = w2.astype(jnp.bfloat16)
    b1_2d = b1.reshape(1, time_dim).astype(jnp.float32)
    b2_2d = b2.reshape(1, time_dim).astype(jnp.float32)

    # Advisory cost so XLA can overlap this tiny kernel with neighbors.
    flops = 2 * bp * (dim * time_dim + time_dim * time_dim)
    transcendentals = bp * (dim + time_dim)                        # sin + tanh
    bytes_accessed = (2 * (dim * time_dim + time_dim * time_dim)   # bf16 weights
                      + 4 * (2 * dim + 2 * time_dim)               # tables+biases
                      + 4 * bp * (1 + time_dim))                   # t + output

    out = pl.pallas_call(
        _time_mlp_kernel,
        out_shape=jax.ShapeDtypeStruct((bp, time_dim), jnp.float32),
        grid=(bp // block_b,),
        in_specs=[
            pl.BlockSpec((block_b, 1), lambda i: (i, 0)),          # timesteps
            pl.BlockSpec((2, dim), lambda i: (0, 0)),              # freq/phase
            pl.BlockSpec((dim, time_dim), lambda i: (0, 0)),       # w1 (bf16)
            pl.BlockSpec((1, time_dim), lambda i: (0, 0)),         # b1
            pl.BlockSpec((time_dim, time_dim), lambda i: (0, 0)),  # w2 (bf16)
            pl.BlockSpec((1, time_dim), lambda i: (0, 0)),         # b2
        ],
        out_specs=pl.BlockSpec((block_b, time_dim), lambda i: (i, 0)),
        compiler_params=pltpu.CompilerParams(
            dimension_semantics=("arbitrary",)),
        cost_estimate=pl.CostEstimate(flops=flops,
                                      transcendentals=transcendentals,
                                      bytes_accessed=bytes_accessed),
    )(x2, jnp.asarray(tbl), w1_bf, b1_2d, w2_bf, b2_2d)

    return out[:B]


def _reference_time_mlp(t, w1, b1, w2, b2, dim):
    """Plain-JAX f32 reference mirroring the PyTorch time_mlp forward."""
    half = dim // 2
    scale = math.log(10000.0) / (half - 1)
    f = jnp.exp(jnp.arange(half, dtype=jnp.float32) * -scale)
    emb = t.astype(jnp.float32)[:, None] * f[None, :]
    emb = jnp.concatenate([jnp.sin(emb), jnp.cos(emb)], axis=-1)
    h = emb @ w1 + b1
    h = 0.5 * h * (1.0 + jnp.tanh(_SQRT_2_OVER_PI * (h + 0.044715 * h ** 3)))
    return h @ w2 + b2


if __name__ == "__main__":
    key = jax.random.PRNGKey(0)
    B, DIM = 8, 32
    TIME_DIM = DIM * 4                     # 128 -> lane-dense output

    k1, k2, k3, k4, k5 = jax.random.split(key, 5)
    # typical diffusion timesteps: positive floats
    t = jax.random.uniform(k1, (B,), jnp.float32, minval=0.0, maxval=1000.0)

    lim1 = 1.0 / math.sqrt(DIM)
    w1 = jax.random.uniform(k2, (DIM, TIME_DIM), jnp.float32, -lim1, lim1)
    b1 = jax.random.uniform(k3, (TIME_DIM,), jnp.float32, -lim1, lim1)
    lim2 = 1.0 / math.sqrt(TIME_DIM)
    w2 = jax.random.uniform(k4, (TIME_DIM, TIME_DIM), jnp.float32, -lim2, lim2)
    b2 = jax.random.uniform(k5, (TIME_DIM,), jnp.float32, -lim2, lim2)

    out = time_mlp(t, w1, b1, w2, b2, DIM)
    out = jax.block_until_ready(out)

    ref = _reference_time_mlp(t, w1, b1, w2, b2, DIM)
    assert out.shape == (B, TIME_DIM)
    # bf16 MXU operands with f32 accumulation vs. pure-f32 reference.
    assert jnp.allclose(out, ref, atol=1e-2, rtol=1e-2), (
        float(jnp.max(jnp.abs(out - ref))))

    print("KERNEL_OK")
</pallas_src>

<mosaic_0001>
module attributes {stable_mosaic.version = 11 : i64} {
  func.func @_time_mlp_kernel(%arg0: i32, %arg1: memref<8x1xf32, #tpu.memory_space<vmem>>, %arg2: memref<2x32xf32, #tpu.memory_space<vmem>>, %arg3: memref<32x128xbf16, #tpu.memory_space<vmem>>, %arg4: memref<1x128xf32, #tpu.memory_space<vmem>>, %arg5: memref<128x128xbf16, #tpu.memory_space<vmem>>, %arg6: memref<1x128xf32, #tpu.memory_space<vmem>>, %arg7: memref<8x128xf32, #tpu.memory_space<vmem>>) attributes {dimension_semantics = [#tpu.dimension_semantics<arbitrary>], iteration_bounds = array<i64: 1>, scalar_prefetch = 0 : i64, scratch_operands = 0 : i64, tpu.core_type = #tpu.core_type<tc>, window_params = [{transform_indices = @transform_0, window_bounds = array<i64: 8, 1>}, {pipeline_mode = #tpu.pipeline_mode<synchronous>, transform_indices = @transform_1, window_bounds = array<i64: 2, 32>}, {pipeline_mode = #tpu.pipeline_mode<synchronous>, transform_indices = @transform_2, window_bounds = array<i64: 32, 128>}, {pipeline_mode = #tpu.pipeline_mode<synchronous>, transform_indices = @transform_3, window_bounds = array<i64: 1, 128>}, {pipeline_mode = #tpu.pipeline_mode<synchronous>, transform_indices = @transform_4, window_bounds = array<i64: 128, 128>}, {pipeline_mode = #tpu.pipeline_mode<synchronous>, transform_indices = @transform_5, window_bounds = array<i64: 1, 128>}, {transform_indices = @transform_6, window_bounds = array<i64: 8, 128>}]} {
    %c0 = arith.constant 0 : index
    %c0_0 = arith.constant 0 : index
    %0 = vector.load %arg1[%c0, %c0_0] : memref<8x1xf32, #tpu.memory_space<vmem>>, vector<8x1xf32>
    %c0_1 = arith.constant 0 : index
    %c0_2 = arith.constant 0 : index
    %1 = vector.load %arg2[%c0_1, %c0_2] : memref<2x32xf32, #tpu.memory_space<vmem>>, vector<1x32xf32>
    %c1 = arith.constant 1 : index
    %c0_3 = arith.constant 0 : index
    %2 = vector.load %arg2[%c1, %c0_3] : memref<2x32xf32, #tpu.memory_space<vmem>>, vector<1x32xf32>
    %3 = vector.broadcast %0 : vector<8x1xf32> to vector<8x32xf32>
    %4 = vector.broadcast %1 : vector<1x32xf32> to vector<8x32xf32>
    %5 = arith.mulf %3, %4 : vector<8x32xf32>
    %6 = vector.broadcast %2 : vector<1x32xf32> to vector<8x32xf32>
    %7 = arith.addf %5, %6 : vector<8x32xf32>
    %8 = math.sin %7 : vector<8x32xf32>
    %9 = arith.truncf %8 : vector<8x32xf32> to vector<8x32xbf16>
    %c0_4 = arith.constant 0 : index
    %c0_5 = arith.constant 0 : index
    %10 = vector.load %arg3[%c0_4, %c0_5] : memref<32x128xbf16, #tpu.memory_space<vmem>>, vector<32x128xbf16>
    %cst = arith.constant dense<0.000000e+00> : vector<8x128xf32>
    %11 = tpu.matmul %9, %10, %cst {dimension_numbers = #tpu.dot_dimension_numbers<[1], [0], [0], [1], [0, 0, 1, 1], [], []>} : vector<8x32xbf16>, vector<32x128xbf16>, vector<8x128xf32> -> vector<8x128xf32>
    %c0_6 = arith.constant 0 : index
    %c0_7 = arith.constant 0 : index
    %12 = vector.load %arg4[%c0_6, %c0_7] : memref<1x128xf32, #tpu.memory_space<vmem>>, vector<1x128xf32>
    %13 = vector.broadcast %12 : vector<1x128xf32> to vector<8x128xf32>
    %14 = arith.addf %11, %13 : vector<8x128xf32>
    %cst_8 = arith.constant 5.000000e-01 : f32
    %15 = vector.broadcast %cst_8 : f32 to vector<8x128xf32>
    %16 = arith.mulf %15, %14 : vector<8x128xf32>
    %cst_9 = arith.constant 4.471500e-02 : f32
    %17 = vector.broadcast %cst_9 : f32 to vector<8x128xf32>
    %18 = arith.mulf %17, %14 : vector<8x128xf32>
    %19 = arith.mulf %18, %14 : vector<8x128xf32>
    %20 = arith.mulf %19, %14 : vector<8x128xf32>
    %21 = arith.addf %14, %20 : vector<8x128xf32>
    %cst_10 = arith.constant 0.797884583 : f32
    %22 = vector.broadcast %cst_10 : f32 to vector<8x128xf32>
    %23 = arith.mulf %22, %21 : vector<8x128xf32>
    %24 = math.tanh %23 : vector<8x128xf32>
    %cst_11 = arith.constant 1.000000e+00 : f32
    %25 = vector.broadcast %cst_11 : f32 to vector<8x128xf32>
    %26 = arith.addf %25, %24 : vector<8x128xf32>
    %27 = arith.mulf %16, %26 : vector<8x128xf32>
    %28 = arith.truncf %27 : vector<8x128xf32> to vector<8x128xbf16>
    %c0_12 = arith.constant 0 : index
    %c0_13 = arith.constant 0 : index
    %29 = vector.load %arg5[%c0_12, %c0_13] : memref<128x128xbf16, #tpu.memory_space<vmem>>, vector<128x128xbf16>
    %cst_14 = arith.constant dense<0.000000e+00> : vector<8x128xf32>
    %30 = tpu.matmul %28, %29, %cst_14 {dimension_numbers = #tpu.dot_dimension_numbers<[1], [0], [0], [1], [0, 0, 1, 1], [], []>} : vector<8x128xbf16>, vector<128x128xbf16>, vector<8x128xf32> -> vector<8x128xf32>
    %c0_15 = arith.constant 0 : index
    %c0_16 = arith.constant 0 : index
    %31 = vector.load %arg6[%c0_15, %c0_16] : memref<1x128xf32, #tpu.memory_space<vmem>>, vector<1x128xf32>
    %32 = vector.broadcast %31 : vector<1x128xf32> to vector<8x128xf32>
    %33 = arith.addf %30, %32 : vector<8x128xf32>
    %c0_17 = arith.constant 0 : index
    %c0_18 = arith.constant 0 : index
    %34 = vector.load %arg7[%c0_17, %c0_18] : memref<8x128xf32, #tpu.memory_space<vmem>>, vector<8x128xf32>
    tpu.vector_store %arg7[%c0_17, %c0_18], %33 {strides = array<i32>} : memref<8x128xf32, #tpu.memory_space<vmem>>, vector<8x128xf32>,
    return
  }
  func.func @transform_0(%arg0: i32) -> (i32, i32) {
    %c0_i32 = arith.constant 0 : i32
    %c0_i32_0 = arith.constant 0 : i32
    return %arg0, %c0_i32 : i32, i32
  }
  func.func @transform_1(%arg0: i32) -> (i32, i32) {
    %c0_i32 = arith.constant 0 : i32
    %c0_i32_0 = arith.constant 0 : i32
    %c0_i32_1 = arith.constant 0 : i32
    return %c0_i32, %c0_i32_0 : i32, i32
  }
  func.func @transform_2(%arg0: i32) -> (i32, i32) {
    %c0_i32 = arith.constant 0 : i32
    %c0_i32_0 = arith.constant 0 : i32
    %c0_i32_1 = arith.constant 0 : i32
    return %c0_i32, %c0_i32_0 : i32, i32
  }
  func.func @transform_3(%arg0: i32) -> (i32, i32) {
    %c0_i32 = arith.constant 0 : i32
    %c0_i32_0 = arith.constant 0 : i32
    %c0_i32_1 = arith.constant 0 : i32
    return %c0_i32, %c0_i32_0 : i32, i32
  }
  func.func @transform_4(%arg0: i32) -> (i32, i32) {
    %c0_i32 = arith.constant 0 : i32
    %c0_i32_0 = arith.constant 0 : i32
    %c0_i32_1 = arith.constant 0 : i32
    return %c0_i32, %c0_i32_0 : i32, i32
  }
  func.func @transform_5(%arg0: i32) -> (i32, i32) {
    %c0_i32 = arith.constant 0 : i32
    %c0_i32_0 = arith.constant 0 : i32
    %c0_i32_1 = arith.constant 0 : i32
    return %c0_i32, %c0_i32_0 : i32, i32
  }
  func.func @transform_6(%arg0: i32) -> (i32, i32) {
    %c0_i32 = arith.constant 0 : i32
    %c0_i32_0 = arith.constant 0 : i32
    return %arg0, %c0_i32 : i32, i32
  }
}

</mosaic_0001>

<bundles_post_ra>
// kernel: tpu_custom_call.1
= control target key start
LH: loop header
LB: loop body
LE: loop exit
PB: predicated region body
PF: predicated region fallthrough
CT: control target
= control target key end

     0   :  { %11 = vsyncpa [#allocation3], 0  ;;  %s685_s0 = inlined_call_operand.vmem [shape: f32[8,1], index: 0, kind: input, shape index: {}]   ;;  %s686_s1 = inlined_call_operand.hbm [shape: f32[2,32], index: 1, kind: input, shape index: {}]   ;;  %s687_s2 = inlined_call_operand.vmem [shape: bf16[32,128], index: 2, kind: input, shape index: {}]   ;;  %s688_s3 = inlined_call_operand.vmem [shape: f32[1,128], index: 3, kind: input, shape index: {}]   ;;  %s689_s4 = inlined_call_operand.hbm [shape: bf16[128,128], index: 4, kind: input, shape index: {}]   ;;  %s690_s5 = inlined_call_operand.vmem [shape: f32[1,128], index: 5, kind: input, shape index: {}]   ;;  %s691_s6 = inlined_call_operand.hbm [shape: f32[8,128], index: 6, kind: output, shape index: {}]  }
   0x1   :  { %12 = vsyncpa [#allocation6], 0 }
   0x2   :  { %13 = vsyncpa [#allocation4], 0  ;;  %s545_s21 = smov [#allocation2]   ;;  %s546_s23 = smov [#allocation5]  }
   0x3   :  { %s22_s22 = sshll.u32 %s545_s21, 4  ;;  %s35_s24 = sshll.u32 %s546_s23, 4  ;;  %s23_s22 = int_to_ptr.vmem [resolvable:$true] %s22_s22  ;;  %s594_s24 = int_to_ptr.vmem [resolvable:$true] %s35_s24 }
   0x4   :  { %s473_s27 = scalar_lea.hbm %s686_s1, 32 }
   0x5   :  { %p474_p0 = scmp.ne.s32.totalorder %s686_s1, %s473_s27  ;;  %p477_p1 = scmp.lt.u32.totalorder %s473_s27, %s686_s1 }
   0x7   :  { %p479_p2 = pnand %p477_p1, %p474_p0 }
   0x9   :  { %482 = shalt.err (!%p479_p2)
}
   0xa   :  { %s483_s8 = scalar_lea.vmem %s23_s22, 32  ;;  %p488_p4 = scmp.lt.s32.totalorder %s23_s22, %s23_s22 }
   0xb   :  { %p484_p3 = scmp.ne.s32.totalorder %s23_s22, %s483_s8  ;;  %p489_p5 = scmp.lt.s32.totalorder %s483_s8, %s483_s8 }
   0xd   :  { %p490_p6 = por %p489_p5, %p488_p4 }
   0xf   :  { %p491_p7 = pnand %p490_p6, %p484_p3 }
  0x11   :  { %494 = shalt.err (!%p491_p7)
}
  0x12   :  { %25 = dma.hbm_to_vmem [thread:$0]  %s686_s1, 32, %s23_s22, [#allocation3]  }
  0x13   :  { %s495_s13 = scalar_lea.hbm %s689_s4, 1024 }
  0x14   :  { %p496_p8 = scmp.ne.s32.totalorder %s689_s4, %s495_s13  ;;  %p499_p9 = scmp.lt.u32.totalorder %s495_s13, %s689_s4 }
  0x16   :  { %p501_p10 = pnand %p499_p9, %p496_p8 }
  0x18   :  { %504 = shalt.err (!%p501_p10)
}
  0x19   :  { %s505_s18 = scalar_lea.vmem %s594_s24, 1024  ;;  %p510_p12 = scmp.lt.s32.totalorder %s594_s24, %s594_s24 }
  0x1a   :  { %p506_p11 = scmp.ne.s32.totalorder %s594_s24, %s505_s18  ;;  %p511_p13 = scmp.lt.s32.totalorder %s505_s18, %s505_s18 }
  0x1c   :  { %p512_p0 = por %p511_p13, %p510_p12 }
  0x1e   :  { %p513_p1 = pnand %p512_p0, %p506_p11 }
  0x20   :  { %516 = shalt.err (!%p513_p1)
}
  0x21   :  { %s547_s1 = smov 64   ;;  %s548_s19 = smov 4  }
  0x22   :  { %41 = dma.hbm_to_vmem [thread:$0]  %s689_s4, 1024, %s594_s24, [#allocation6], %s547_s1, %s547_s1, %s548_s19  }
  0x23   :  { %539 = dma.done.wait [#allocation3], 32  }
  0x24   :  { %540 = vsyncadd [#allocation3], 4294967264 }
  0x25   :  { %541 = dma.done.wait [#allocation6], 1024  }
  0x26   :  { %542 = vsyncadd [#allocation6], 4294966272  ;;  %v549_v0 = vmov 0   ;;  %v51_v1 = vld [vmem:[%s685_s0] sm:$0xff]  ;;  %v550_v3 = vmov 0.0   ;;  %vm551_vm0 = vmmov 0  }
  0x27   :  { %456 = vset.pattern.permute.xlu0 %v549_v0  ;;  %v457_v2 = vld [vmem:[%s687_s2] sm:$0xff]   ;;  %410 = vmatprep.subr.bf16.mxu0 %v550_v3  ;;  %v458_v4 = vld [vmem:[%s687_s2 + $0x8] sm:$0xff]   ;;  %v552_v21 = vmov 683565275   ;;  %v553_v23 = vmov 2475754826  }
  0x28   :  { %56 = vperm.xlu0 %456, %v51_v1   ;;  %414 = vmatprep.mubr.msk.bf16.mxu0 %vm551_vm0, %v550_v3  ;;  %v459_v5 = vld [vmem:[#allocation5] sm:$0xff]   ;;  %v379_v6 = vld [vmem:[#allocation2] ss:$0 sm:$0xff]  ;;  %v380_v7 = vld [vmem:[#allocation2 + $0x1] ss:$0 sm:$0xff]  ;;  %vm197_vm14 = vcmask 261120  }
  0x29   :  { %411 = vmatpush3.bf16.msra.mxu0 %v457_v2  ;;  %418 = vmatprep.subr.bf16.mxu1 %v550_v3  ;;  %v554_v26 = vmov 2131351028   ;;  %v555_v29 = vmov 2102212464   ;;  %v556_v32 = vmov 920167782  }
  0x2a   :  { %412 = vmatprep.subr.bf16.mxu0 %v550_v3  ;;  %434 = vmatprep.mubr.msk.bf16.mxu1 %vm551_vm0, %v550_v3  ;;  %v557_v35 = vmov 1326507024  }
  0x2b   :  { %419 = vmatpush3.bf16.msra.mxu1 %v459_v5 }
  0x2c   :  { %420 = vmatprep.subr.bf16.mxu1 %v550_v3 }
  0x2d   :  { %413 = vmatpush3.bf16.msra.mxu0 %v458_v4 }
  0xa7   :  { %v57_v8 = vpop.permute.xlu0 %56 }
  0xa8   :  { %v63_v9 = vmul.f32 %v379_v6, %v57_v8 }
  0xaa   :  { %v640_v10 = vadd.f32 %v380_v7, %v63_v9 }
  0xac   :  { %v72_v11 = vand.u32 2139095040, %v640_v10  ;;  %v69_v15 = vand.u32 2147483647, %v640_v10  ;;  %vm71_vm8 = vcmp.lt.s32.totalorder %v640_v10, 0  ;;  %vm161_vm13 = vweird.f32 %v640_v10 }
  0xae   :  { %v73_v12 = vshrl.u32 %v72_v11, 23  ;;  %v76_v18 = vand.u32 8388607, %v69_v15  ;;  %vm70_vm9 = vcmp.le.f32.partialorder %v69_v15, 0.7853982 }
  0xb0   :  { %v381_v13 = vadd.s32 4294967169, %v73_v12  ;;  %v77_v37 = vor.u32 8388608, %v76_v18 }
  0xb2   :  { %v79_v14 = vadd.s32 1, %v381_v13  ;;  %v117_v51 = vshll.u32 %v77_v37, 8 }
  0xb4   :  { %vm80_vm1 = vcmp.gt.s32.totalorder %v79_v14, 0 }
  0xb5   :  { %v81_v16 = vsel %vm80_vm1, %v79_v14, 0 }
  0xb6   :  { %v83_v17 = vand.u32 31, %v81_v16  ;;  %v82_v20 = vshrl.u32 %v81_v16, 5 }
  0xb8   :  { %v84_v19 = vsub.s32 32, %v83_v17  ;;  %v86_v22 = vshll.u32 %v552_v21, %v83_v17  ;;  %v89_v24 = vshll.u32 %v553_v23, %v83_v17  ;;  %v92_v28 = vshll.u32 %v554_v26, %v83_v17 }
  0xb9   :  { %v95_v31 = vshll.u32 %v555_v29, %v83_v17  ;;  %v98_v34 = vshll.u32 %v556_v32, %v83_v17  ;;  %vm101_vm2 = vcmp.lt.s32.totalorder %v82_v20, 1  ;;  %vm104_vm3 = vcmp.lt.s32.totalorder %v82_v20, 4 }
  0xba   :  { %v87_v25 = vshrl.u32 %v553_v23, %v84_v19  ;;  %v90_v27 = vshrl.u32 %v554_v26, %v84_v19  ;;  %v93_v30 = vshrl.u32 %v555_v29, %v84_v19  ;;  %v96_v33 = vshrl.u32 %v556_v32, %v84_v19 }
  0xbb   :  { %v99_v36 = vshrl.u32 %v557_v35, %v84_v19  ;;  %v85_v46 = vshrl.u32 %v552_v21, %v84_v19  ;;  %vm103_vm4 = vcmp.lt.s32.totalorder %v82_v20, 3  ;;  %vm102_vm5 = vcmp.lt.s32.totalorder %v82_v20, 2 }
  0xbc   :  { %v88_v38 = vor.u32 %v87_v25, %v86_v22  ;;  %v91_v39 = vor.u32 %v90_v27, %v89_v24  ;;  %v94_v40 = vor.u32 %v93_v30, %v92_v28  ;;  %v97_v41 = vor.u32 %v96_v33, %v95_v31 }
  0xbd   :  { %v100_v42 = vor.u32 %v99_v36, %v98_v34 }
  0xbe   :  { %v106_v43 = vsel %vm104_vm3, %v94_v40, 2102212464  ;;  %v109_v44 = vsel %vm101_vm2, %v88_v38, %v91_v39  ;;  %v113_v45 = vsel %vm101_vm2, %v91_v39, %v94_v40  ;;  %v110_v47 = vsel %vm104_vm3, %v97_v41, 920167782 }
  0xbf   :  { %v114_v48 = vsel %vm104_vm3, %v100_v42, 1326507024  ;;  %v111_v49 = vsel %vm103_vm4, %v94_v40, %v110_v47  ;;  %v105_v52 = vsel %vm101_vm2, %v85_v46, %v88_v38  ;;  %v107_v53 = vsel %vm103_vm4, %v91_v39, %v106_v43  ;;  %v461_v42 = vld [vmem:[#allocation5 + $0x10] sm:$0xff]   ;;  %v462_v43 = vld [vmem:[#allocation5 + $0x18] sm:$0xff]  }
  0xc0   :  { %v115_v50 = vsel %vm103_vm4, %v97_v41, %v114_v48  ;;  %v112_v54 = vsel %vm102_vm5, %v109_v44, %v111_v49  ;;  %v108_v60 = vsel %vm102_vm5, %v105_v52, %v107_v53  ;;  %v460_v41 = vld [vmem:[#allocation5 + $0x8] sm:$0xff]   ;;  %v463_v44 = vld [vmem:[#allocation5 + $0x20] sm:$0xff]   ;;  %v466_v46 = vld [vmem:[#allocation5 + $0x38] sm:$0xff]  }
  0xc1   :  { %v116_v55 = vsel %vm102_vm5, %v113_v45, %v115_v50  ;;  %v649_v58 = vmul.u32.u64.low %v117_v51, %v112_v54  ;;  %v650_v59 = vmul.u32.u64.high %v117_v51, %v112_v54, %v649_v58  ;;  %v124_v62 = vmul.u32 %v117_v51, %v108_v60  ;;  %421 = vmatpush3.bf16.msra.mxu1 %v460_v41  ;;  %v465_v45 = vld [vmem:[#allocation5 + $0x30] sm:$0xff]   ;;  %v385_v47 = vld [vmem:[%s688_s3] ss:$0 sm:$0xff]  ;;  %s558_s3 = smov [#allocation7]  }
  0xc2   :  { %v646_v56 = vmul.u32.u64.low %v117_v51, %v116_v55  ;;  %v647_v57 = vmul.u32.u64.high %v117_v51, %v116_v55, %v646_v56  ;;  %422 = vmatprep.subr.bf16.mxu1 %v550_v3  ;;  %s369_s29 = sshll.u32 %s558_s3, 4  ;;  %s370_s29 = int_to_ptr.vmem [resolvable:$true] %s369_s29 }
  0xc3   :  { %v127_v61 = vadd.s32 1, %v650_v59  ;;  %s517_s30 = scalar_lea.vmem %s370_s29, 128  ;;  %p522_p3 = scmp.lt.s32.totalorder %s370_s29, %s370_s29 }
  0xc4   :  { %vm126_vm6 = vc.u32 %v647_v57, %v649_v58  ;;  %v125_v12 = vadd.s32 %v649_v58, %v647_v57  ;;  %p518_p2 = scmp.ne.s32.totalorder %s370_s29, %s517_s30  ;;  %p523_p4 = scmp.lt.s32.totalorder %s517_s30, %s517_s30 }
  0xc5   :  { %v128_v63 = vsel %vm126_vm6, %v127_v61, %v650_v59  ;;  %423 = vmatpush3.bf16.msra.mxu1 %v461_v42 }
  0xc6   :  { %v129_v0 = vadd.s32 %v128_v63, %v124_v62  ;;  %424 = vmatprep.subr.bf16.mxu1 %v550_v3  ;;  %v389_v62 = vld [vmem:[%s690_s5] ss:$0 sm:$0xff]  ;;  %p524_p5 = por %p523_p4, %p522_p3 }
  0xc8   :  { %v130_v1 = vadd.s32 536870912, %v129_v0  ;;  %p525_p6 = pnand %p524_p5, %p518_p2 }
  0xc9   :  { %425 = vmatpush3.bf16.msra.mxu1 %v462_v43 }
  0xca   :  { %v131_v2 = vshrl.u32 %v130_v1, 30  ;;  %426 = vmatprep.subr.bf16.mxu1 %v550_v3 }
  0xcc   :  { %v132_v4 = vshll.u32 %v131_v2, 30  ;;  %v155_v25 = vsub.s32 4, %v131_v2 }
  0xcd   :  { %427 = vmatpush3.bf16.msra.mxu1 %v463_v44 }
  0xce   :  { %v133_v5 = vsub.s32 %v129_v0, %v132_v4  ;;  %v156_v28 = vsel %vm71_vm8, %v155_v25, %v131_v2  ;;  %428 = vmatprep.subr.bf16.mxu1 %v550_v3 }
  0xcf   :  { %v158_v30 = vsel %vm70_vm9, 0, %v156_v28 }
  0xd0   :  { %v135_v6 = vsub.s32 0, %v133_v5  ;;  %v162_v31 = vadd.s32 3, %v158_v30 }
  0xd2   :  { %v382_v7 = vmin.u32 %v135_v6, %v133_v5  ;;  %v163_v32 = vand.u32 3, %v162_v31 }
  0xd4   :  { %v137_v8 = vclz %v382_v7  ;;  %vm168_vm10 = vcmp.eq.s32.totalorder %v163_v32, 2  ;;  %vm165_vm11 = vcmp.eq.s32.totalorder %v163_v32, 0  ;;  %vm164_vm12 = vcmp.lt.s32.totalorder %v163_v32, 2 }
  0xd6   :  { %v383_v9 = vadd.s32 4294967294, %v137_v8 }
  0xd8   :  { %vm384_vm7 = vcmp.lt.s32.totalorder %v383_v9, 0 }
  0xd9   :  { %v140_v11 = vsel %vm384_vm7, 0, %v383_v9 }
  0xda   :  { %v141_v13 = vsub.s32 32, %v140_v11  ;;  %v145_v14 = vsub.s32 4294967266, %v140_v11  ;;  %v142_v16 = vshll.u32 %v133_v5, %v140_v11 }
  0xdc   :  { %v143_v17 = vshrl.u32 %v125_v12, %v141_v13  ;;  %v146_v18 = vadd.s32 127, %v145_v14 }
  0xde   :  { %v144_v19 = vor.u32 %v143_v17, %v142_v16  ;;  %v147_v20 = vshll.u32 %v146_v18, 23 }
  0xe0   :  { %v148_v21 = vor.u32 4788187, %v147_v20  ;;  %v151_v23 = vcvt.s32.f32 %v144_v19 }
  0xe2   :  { %v149_v22 = vand.u32 2147483647, %v148_v21 }
  0xe4   :  { %v152_v24 = vmul.f32 %v151_v23, %v149_v22 }
  0xe6   :  { %v153_v26 = vxor.u32 2147483648, %v152_v24 }
  0xe8   :  { %v154_v27 = vsel %vm71_vm8, %v153_v26, %v152_v24 }
  0xe9   :  { %v157_v29 = vsel %vm70_vm9, %v640_v10, %v154_v27  ;;  %v464_v10 = vld [vmem:[#allocation5 + $0x28] sm:$0xff]  }
  0xea   :  { %467 = vcosq.f32 %v157_v29  ;;  %429 = vmatpush3.bf16.msra.mxu1 %v464_v10 }
  0xeb   :  { %469 = vsinq.f32 %v157_v29  ;;  %430 = vmatprep.subr.bf16.mxu1 %v550_v3 }
  0xee   :  { %431 = vmatpush3.bf16.msra.mxu1 %v465_v45 }
  0xef   :  { %432 = vmatprep.subr.bf16.mxu1 %v550_v3 }
  0xf2   :  { %433 = vmatpush3.bf16.msra.mxu1 %v466_v46 }
  0xf4   :  { %v468_v33 = vpop.eup %467 }
  0xf5   :  { %v470_v34 = vpop.eup %469  ;;  %v169_v35 = vxor.u32 2147483648, %v468_v33 }
  0xf6   :  { %v166_v36 = vxor.u32 2147483648, %v470_v34 }
  0xf7   :  { %v170_v37 = vsel %vm168_vm10, %v169_v35, %v470_v34 }
  0xf8   :  { %v167_v38 = vsel %vm165_vm11, %v468_v33, %v166_v36 }
  0xf9   :  { %v171_v15 = vsel %vm164_vm12, %v167_v38, %v170_v37 }
  0xfa   :  { %v172_v39 = vsel %vm161_vm13, nan, %v171_v15 }
  0xfb   :  { %v173_v40 = vpack.c.bf16 %v172_v39, %v172_v39 }
  0xfd   :  { %415 = vmatmul.mubr.msk.bf16.vlgmr.msra.gmra.mrb[0].mxu0 %vm197_vm14, %v173_v40 }
 0x1d0   :  { %v235_v48 = vpop.f32.mrb[0].mxu0 }
 0x1d1   :  { %v236_v49 = vadd.f32 %v385_v47, %v235_v48  ;;  %v416_v50 = vpop.f32.mrb[1].mxu0 }
 0x1d2   :  { %v238_v51 = vpop.f32.mrb[2].mxu0 }
 0x1d3   :  { %v242_v52 = vmul.f32 0.044715, %v236_v49  ;;  %v417_v53 = vpop.f32.mrb[3].mxu0  ;;  %v241_v59 = vmul.f32 0.5, %v236_v49 }
 0x1d5   :  { %v243_v54 = vmul.f32 %v242_v52, %v236_v49 }
 0x1d7   :  { %v244_v55 = vmul.f32 %v243_v54, %v236_v49 }
 0x1d9   :  { %v245_v56 = vadd.f32 %v244_v55, %v236_v49 }
 0x1db   :  { %v246_v57 = vmul.f32 0.7978846, %v245_v56 }
 0x1dd   :  { %471 = vtanh.f32 %v246_v57 }
 0x1e7   :  { %v472_v58 = vpop.eup %471 }
 0x1e8   :  { %v248_v60 = vadd.f32 1.0, %v472_v58 }
 0x1ea   :  { %v249_v3 = vmul.f32 %v248_v60, %v241_v59 }
 0x1ec   :  { %v250_v61 = vpack.c.bf16 %v249_v3, %v249_v3 }
 0x1ee   :  { %435 = vmatmul.mubr.bf16.vlgmr.msra.gmra.mrb[0].mxu1 %v250_v61 }
 0x2c1   :  { %v356_v63 = vpop.f32.mrb[0].mxu1 }
 0x2c2   :  { %v357_v0 = vadd.f32 %v389_v62, %v356_v63  ;;  %v436_v1 = vpop.f32.mrb[1].mxu1 }
 0x2c3   :  { %v359_v2 = vpop.f32.mrb[2].mxu1 }
 0x2c4   :  { %362 = vst [vmem:[#allocation7] sm:$0xff] %v357_v0  ;;  %v437_v4 = vpop.f32.mrb[3].mxu1 }
 0x2c5   :  { %528 = shalt.err (!%p525_p6)
}
 0x2c6   :  { %s529_s5 = scalar_lea.hbm %s691_s6, 128 }
 0x2c7   :  { %p530_p7 = scmp.ne.s32.totalorder %s691_s6, %s529_s5  ;;  %p533_p8 = scmp.lt.u32.totalorder %s529_s5, %s691_s6 }
 0x2c9   :  { %p535_p9 = pnand %p533_p8, %p530_p7 }
 0x2cb   :  { %538 = shalt.err (!%p535_p9)
}
 0x2cc   :  { %372 = dma.vmem_to_hbm [thread:$0]  %s370_s29, 128, %s691_s6, [#allocation4]  }
 0x2cd   :  { %543 = dma.done.wait [#allocation4], 128  }
 0x2ce   :  { %544 = vsyncadd [#allocation4], 4294967168 }
 0x2cf   :  { %376 = vsyncpa [#allocation3], 1 }
 0x2d0   :  { %377 = vsyncpa [#allocation6], 1 }
 0x2d1   :  { %378 = vsyncpa [#allocation4], 1 }

</bundles_post_ra>
